<compile_context>
chip_gen: v6e
topology: v6e:2x2x1
jax: 0.10.0
libtpu: 0.0.40
codegen_flags: <defaults>
</compile_context>

<pallas_src>
import jax
import jax.numpy as jnp
from jax import lax
from jax.experimental import pallas as pl
from jax.experimental.pallas import tpu as pltpu


def _make_nonlocal_kernel(CI, M, TM, num_chunks):
    """Builds the per-batch kernel. CI = C//2, M = H*W//2, TM | M."""
    C = 2 * CI

    def kernel(x_ref, wpack_ref, wmask_ref, o_ref, proj_ref, y0_ref, y1_ref):
        cdt = x_ref.dtype                      # compute dtype (f32 or bf16)
        x = x_ref[0]                           # (C, N)

        # Fused 1x1 convs (no bias): one MXU matmul for phi/theta/g.
        proj = jnp.dot(wpack_ref[...], x, preferred_element_type=jnp.float32)
        proj_ref[...] = proj.astype(proj_ref.dtype)          # (3*CI, N)

        # theta halves are loop-invariant (full m axis): rows [CI, 2*CI).
        th0 = proj_ref[pl.ds(CI, CI), pl.ds(0, M)]            # (CI, M)
        th1 = proj_ref[pl.ds(CI, CI), pl.ds(M, M)]            # (CI, M)

        # y accumulators (f32), one per spatial half.
        y0_ref[...] = jnp.zeros_like(y0_ref)
        y1_ref[...] = jnp.zeros_like(y1_ref)

        def body(j, carry):
            off0 = pl.multiple_of(j * TM, TM)          # m' chunk, first half
            off1 = pl.multiple_of(M + j * TM, TM)      # m' chunk, second half
            ph0 = proj_ref[pl.ds(0, CI), pl.ds(off0, TM)]         # (CI, TM)
            ph1 = proj_ref[pl.ds(0, CI), pl.ds(off1, TM)]
            g0 = proj_ref[pl.ds(2 * CI, CI), pl.ds(off0, TM)]
            g1 = proj_ref[pl.ds(2 * CI, CI), pl.ds(off1, TM)]

            # scores (M, TM): contract over the inter-channel axis; the sum of
            # the two half-products equals the folded-channel contraction.
            s = lax.dot_general(th0, ph0, (((0,), (0,)), ((), ())),
                                preferred_element_type=jnp.float32)
            s = s + lax.dot_general(th1, ph1, (((0,), (0,)), ((), ())),
                                    preferred_element_type=jnp.float32)

            # Softmax over axis 0 (torch Softmax(dim=1)); each m' column is
            # fully contained in this chunk, so no online-softmax is needed.
            s = s - jnp.max(s, axis=0, keepdims=True)
            e = jnp.exp(s)                                        # (M, TM) f32
            inv = 1.0 / jnp.sum(e, axis=0, keepdims=True)         # (1, TM)

            # Normalize by scaling g's columns (C*TM mults) instead of the
            # (M, TM) score block.
            e_c = e.astype(cdt)
            g0s = (g0.astype(jnp.float32) * inv).astype(cdt)
            g1s = (g1.astype(jnp.float32) * inv).astype(cdt)

            y0_ref[...] += lax.dot_general(g0s, e_c, (((1,), (1,)), ((), ())),
                                           preferred_element_type=jnp.float32)
            y1_ref[...] += lax.dot_general(g1s, e_c, (((1,), (1,)), ((), ())),
                                           preferred_element_type=jnp.float32)
            return carry

        lax.fori_loop(0, num_chunks, body, 0)

        # conv_mask (1x1, CI -> C) per half, then residual add.
        wm = wmask_ref[...]                                       # (C, CI)
        m0 = jnp.dot(wm, y0_ref[...].astype(cdt),
                     preferred_element_type=jnp.float32)          # (C, M)
        m1 = jnp.dot(wm, y1_ref[...].astype(cdt),
                     preferred_element_type=jnp.float32)          # (C, M)
        o_ref[0, :, :M] = (m0 + x[:, :M].astype(jnp.float32)).astype(o_ref.dtype)
        o_ref[0, :, M:] = (m1 + x[:, M:].astype(jnp.float32)).astype(o_ref.dtype)

    return kernel


def nonlocal_block(x, w_phi, w_theta, w_g, w_mask, *, compute_dtype=None):
    """x: (B, C, H, W) NCHW. Weights: (C//2, C) x3, (C, C//2).

    compute_dtype: optional (e.g. jnp.bfloat16) — dtype used for the MXU
    matmuls and the HBM-resident slabs; softmax / accumulation stay in f32.
    """
    B, C, H, W = x.shape
    assert C % 2 == 0, "channel count must be even"
    CI = C // 2
    N = H * W
    assert N % 2 == 0, "h*w must be even for the .view(b, c, -1) fold"
    M = N // 2

    # m' chunk size: as lane-dense as possible while dividing M.
    TM = M
    for cand in (1024, 512, 256, 128):
        if M % cand == 0:
            TM = cand
            break
    num_chunks = M // TM

    orig_dtype = x.dtype
    cdt = jnp.dtype(compute_dtype) if compute_dtype is not None else jnp.dtype(x.dtype)

    x2 = x.reshape(B, C, N).astype(cdt)
    w_pack = jnp.concatenate([w_phi, w_theta, w_g], axis=0).astype(cdt)  # (3*CI, C)
    w_mask_c = w_mask.astype(cdt)                                        # (C, CI)

    # VMEM footprint estimate (double-buffered I/O + weights + scratch +
    # per-chunk score temporaries), clamped under v7x physical VMEM.
    isz = cdt.itemsize
    vmem_need = (
        4 * C * N * isz                       # x in + out (double-buffered)
        + 2 * (3 * CI * C + C * CI) * isz     # packed weights + mask weight
        + 3 * CI * N * isz                    # proj scratch
        + 2 * CI * M * 4                      # f32 y accumulators
        + 3 * M * TM * 4                      # score-chunk temporaries
    )
    vmem_limit = int(min(max(2 * vmem_need, 32 * 1024 * 1024), 60 * 1024 * 1024))

    kernel = _make_nonlocal_kernel(CI, M, TM, num_chunks)

    out = pl.pallas_call(
        kernel,
        out_shape=jax.ShapeDtypeStruct((B, C, N), cdt),
        grid_spec=pltpu.PrefetchScalarGridSpec(
            num_scalar_prefetch=0,
            grid=(B,),
            in_specs=[
                pl.BlockSpec((1, C, N), lambda b: (b, 0, 0)),
                pl.BlockSpec((3 * CI, C), lambda b: (0, 0)),   # stays resident
                pl.BlockSpec((C, CI), lambda b: (0, 0)),       # stays resident
            ],
            out_specs=pl.BlockSpec((1, C, N), lambda b: (b, 0, 0)),
            scratch_shapes=[
                pltpu.VMEM((3 * CI, N), cdt),        # fused phi/theta/g proj
                pltpu.VMEM((CI, M), jnp.float32),    # y accumulator, half 0
                pltpu.VMEM((CI, M), jnp.float32),    # y accumulator, half 1
            ],
        ),
        compiler_params=pltpu.CompilerParams(
            dimension_semantics=("parallel",),
            vmem_limit_bytes=vmem_limit,
        ),
    )(x2, w_pack, w_mask_c)

    return out.reshape(B, C, H, W).astype(orig_dtype)


def nonlocal_block_reference(x, w_phi, w_theta, w_g, w_mask):
    """Pure-JAX mirror of the PyTorch forward (for verification)."""
    B, C, H, W = x.shape
    CI = C // 2
    conv = lambda w, t: jnp.einsum('oc,bchw->bohw', w, t)
    x_phi = conv(w_phi, x).reshape(B, C, -1)
    x_theta = conv(w_theta, x).reshape(B, C, -1).transpose(0, 2, 1)
    x_g = conv(w_g, x).reshape(B, C, -1).transpose(0, 2, 1)
    a = jnp.matmul(x_theta, x_phi)
    a = jax.nn.softmax(a, axis=1)          # torch Softmax(dim=1)
    y = jnp.matmul(a, x_g)
    y = y.transpose(0, 2, 1).reshape(B, CI, H, W)
    mask = conv(w_mask, y)
    return mask + x


if __name__ == "__main__":
    B, C, H, W = 2, 4, 16, 16
    CI = C // 2

    key = jax.random.PRNGKey(0)
    kx, kp, kt, kg, km = jax.random.split(key, 5)
    x = jax.random.normal(kx, (B, C, H, W), dtype=jnp.float32)
    # Conv2d 1x1, no bias -> (out_ch, in_ch) weight matrices.
    w_phi = jax.random.normal(kp, (CI, C), dtype=jnp.float32) * 0.1
    w_theta = jax.random.normal(kt, (CI, C), dtype=jnp.float32) * 0.1
    w_g = jax.random.normal(kg, (CI, C), dtype=jnp.float32) * 0.1
    w_mask = jax.random.normal(km, (C, CI), dtype=jnp.float32) * 0.1

    ref = nonlocal_block_reference(x, w_phi, w_theta, w_g, w_mask)

    # f32 path: must match the reference tightly.
    out = jax.block_until_ready(nonlocal_block(x, w_phi, w_theta, w_g, w_mask))
    if not jnp.allclose(out, ref, atol=2e-4, rtol=2e-4):
        raise AssertionError("Pallas kernel (f32) does not match JAX reference")

    # bf16 compute path (v6e/v7x MXU-native, softmax kept in f32): loose check.
    out_bf16 = jax.block_until_ready(
        nonlocal_block(x, w_phi, w_theta, w_g, w_mask, compute_dtype=jnp.bfloat16))
    if not jnp.allclose(out_bf16, ref, atol=1e-1, rtol=5e-2):
        raise AssertionError("Pallas kernel (bf16) drifted too far from reference")

    print("KERNEL_OK")
</pallas_src>

<mosaic_0001>
module attributes {stable_mosaic.version = 11 : i64} {
  func.func @kernel(%arg0: i32, %arg1: memref<1x4x256xf32, #tpu.memory_space<vmem>>, %arg2: memref<6x4xf32, #tpu.memory_space<vmem>>, %arg3: memref<4x2xf32, #tpu.memory_space<vmem>>, %arg4: memref<1x4x256xf32, #tpu.memory_space<vmem>>, %arg5: memref<6x256xf32, #tpu.memory_space<vmem>>, %arg6: memref<2x128xf32, #tpu.memory_space<vmem>>, %arg7: memref<2x128xf32, #tpu.memory_space<vmem>>) attributes {dimension_semantics = [#tpu.dimension_semantics<parallel>], iteration_bounds = array<i64: 2>, scalar_prefetch = 0 : i64, scratch_operands = 3 : i64, tpu.core_type = #tpu.core_type<tc>, window_params = [{transform_indices = @transform_0, window_bounds = array<i64: 1, 4, 256>}, {pipeline_mode = #tpu.pipeline_mode<synchronous>, transform_indices = @transform_1, window_bounds = array<i64: 6, 4>}, {pipeline_mode = #tpu.pipeline_mode<synchronous>, transform_indices = @transform_2, window_bounds = array<i64: 4, 2>}, {transform_indices = @transform_3, window_bounds = array<i64: 1, 4, 256>}]} {
    %c0 = arith.constant 0 : index
    %c0_0 = arith.constant 0 : index
    %c0_1 = arith.constant 0 : index
    %0 = vector.load %arg1[%c0, %c0_0, %c0_1] : memref<1x4x256xf32, #tpu.memory_space<vmem>>, vector<1x4x256xf32>
    %1 = vector.shape_cast %0 : vector<1x4x256xf32> to vector<4x256xf32>
    %c0_2 = arith.constant 0 : index
    %c0_3 = arith.constant 0 : index
    %2 = vector.load %arg2[%c0_2, %c0_3] : memref<6x4xf32, #tpu.memory_space<vmem>>, vector<6x4xf32>
    %cst = arith.constant dense<0.000000e+00> : vector<6x256xf32>
    %3 = tpu.matmul %2, %1, %cst {dimension_numbers = #tpu.dot_dimension_numbers<[1], [0], [0], [1], [0, 0, 1, 1], [], []>} : vector<6x4xf32>, vector<4x256xf32>, vector<6x256xf32> -> vector<6x256xf32>
    %c0_4 = arith.constant 0 : index
    %c0_5 = arith.constant 0 : index
    %4 = vector.load %arg5[%c0_4, %c0_5] : memref<6x256xf32, #tpu.memory_space<vmem>>, vector<6x256xf32>
    tpu.vector_store %arg5[%c0_4, %c0_5], %3 {strides = array<i32>} : memref<6x256xf32, #tpu.memory_space<vmem>>, vector<6x256xf32>,
    %c2 = arith.constant 2 : index
    %c0_6 = arith.constant 0 : index
    %5 = vector.load %arg5[%c2, %c0_6] : memref<6x256xf32, #tpu.memory_space<vmem>>, vector<2x128xf32>
    %c2_7 = arith.constant 2 : index
    %c128 = arith.constant 128 : index
    %6 = vector.load %arg5[%c2_7, %c128] : memref<6x256xf32, #tpu.memory_space<vmem>>, vector<2x128xf32>
    %cst_8 = arith.constant 0.000000e+00 : f32
    %7 = vector.broadcast %cst_8 : f32 to vector<2x128xf32>
    %c0_9 = arith.constant 0 : index
    %c0_10 = arith.constant 0 : index
    %8 = vector.load %arg6[%c0_9, %c0_10] : memref<2x128xf32, #tpu.memory_space<vmem>>, vector<2x128xf32>
    tpu.vector_store %arg6[%c0_9, %c0_10], %7 {strides = array<i32>} : memref<2x128xf32, #tpu.memory_space<vmem>>, vector<2x128xf32>,
    %cst_11 = arith.constant 0.000000e+00 : f32
    %9 = vector.broadcast %cst_11 : f32 to vector<2x128xf32>
    %c0_12 = arith.constant 0 : index
    %c0_13 = arith.constant 0 : index
    %10 = vector.load %arg7[%c0_12, %c0_13] : memref<2x128xf32, #tpu.memory_space<vmem>>, vector<2x128xf32>
    tpu.vector_store %arg7[%c0_12, %c0_13], %9 {strides = array<i32>} : memref<2x128xf32, #tpu.memory_space<vmem>>, vector<2x128xf32>,
    %c0_i32 = arith.constant 0 : i32
    %c128_i32 = arith.constant 128 : i32
    %11 = arith.muli %c0_i32, %c128_i32 : i32
    %12 = tpu.assume_multiple %11, 128 : i32
    %c128_i32_14 = arith.constant 128 : i32
    %13 = arith.muli %c0_i32, %c128_i32_14 : i32
    %c128_i32_15 = arith.constant 128 : i32
    %14 = arith.addi %c128_i32_15, %13 : i32
    %15 = tpu.assume_multiple %14, 128 : i32
    %c0_16 = arith.constant 0 : index
    %16 = arith.index_cast %12 : i32 to index
    %17 = vector.load %arg5[%c0_16, %16] : memref<6x256xf32, #tpu.memory_space<vmem>>, vector<2x128xf32>
    %c0_17 = arith.constant 0 : index
    %18 = arith.index_cast %15 : i32 to index
    %19 = vector.load %arg5[%c0_17, %18] : memref<6x256xf32, #tpu.memory_space<vmem>>, vector<2x128xf32>
    %c4 = arith.constant 4 : index
    %20 = arith.index_cast %12 : i32 to index
    %21 = vector.load %arg5[%c4, %20] : memref<6x256xf32, #tpu.memory_space<vmem>>, vector<2x128xf32>
    %c4_18 = arith.constant 4 : index
    %22 = arith.index_cast %15 : i32 to index
    %23 = vector.load %arg5[%c4_18, %22] : memref<6x256xf32, #tpu.memory_space<vmem>>, vector<2x128xf32>
    %cst_19 = arith.constant dense<0.000000e+00> : vector<128x128xf32>
    %24 = tpu.matmul %5, %17, %cst_19 {dimension_numbers = #tpu.dot_dimension_numbers<[0], [0], [1], [1], [0, 1, 1, 1], [], []>} : vector<2x128xf32>, vector<2x128xf32>, vector<128x128xf32> -> vector<128x128xf32>
    %cst_20 = arith.constant dense<0.000000e+00> : vector<128x128xf32>
    %25 = tpu.matmul %6, %19, %cst_20 {dimension_numbers = #tpu.dot_dimension_numbers<[0], [0], [1], [1], [0, 1, 1, 1], [], []>} : vector<2x128xf32>, vector<2x128xf32>, vector<128x128xf32> -> vector<128x128xf32>
    %26 = arith.addf %24, %25 : vector<128x128xf32>
    %cst_21 = arith.constant dense<0xFF800000> : vector<128xf32>
    %27 = vector.multi_reduction <maximumf>, %26, %cst_21 [0] : vector<128x128xf32> to vector<128xf32>
    %28 = vector.shape_cast %27 : vector<128xf32> to vector<1x128xf32>
    %29 = vector.broadcast %28 : vector<1x128xf32> to vector<128x128xf32>
    %30 = arith.subf %26, %29 : vector<128x128xf32>
    %31 = math.exp %30 : vector<128x128xf32>
    %cst_22 = arith.constant dense<0.000000e+00> : vector<128xf32>
    %32 = vector.multi_reduction <add>, %31, %cst_22 [0] : vector<128x128xf32> to vector<128xf32>
    %33 = vector.shape_cast %32 : vector<128xf32> to vector<1x128xf32>
    %cst_23 = arith.constant 1.000000e+00 : f32
    %34 = vector.broadcast %cst_23 : f32 to vector<1x128xf32>
    %35 = arith.divf %34, %33 : vector<1x128xf32>
    %36 = vector.broadcast %35 : vector<1x128xf32> to vector<2x128xf32>
    %37 = arith.mulf %21, %36 : vector<2x128xf32>
    %38 = vector.broadcast %35 : vector<1x128xf32> to vector<2x128xf32>
    %39 = arith.mulf %23, %38 : vector<2x128xf32>
    %c0_24 = arith.constant 0 : index
    %c0_25 = arith.constant 0 : index
    %40 = vector.load %arg6[%c0_24, %c0_25] : memref<2x128xf32, #tpu.memory_space<vmem>>, vector<2x128xf32>
    %cst_26 = arith.constant dense<0.000000e+00> : vector<2x128xf32>
    %41 = tpu.matmul %37, %31, %cst_26 {dimension_numbers = #tpu.dot_dimension_numbers<[1], [1], [0], [0], [0, 0, 1, 0], [], []>} : vector<2x128xf32>, vector<128x128xf32>, vector<2x128xf32> -> vector<2x128xf32>
    %42 = arith.addf %40, %41 : vector<2x128xf32>
    %c0_27 = arith.constant 0 : index
    %c0_28 = arith.constant 0 : index
    %43 = vector.load %arg6[%c0_27, %c0_28] : memref<2x128xf32, #tpu.memory_space<vmem>>, vector<2x128xf32>
    tpu.vector_store %arg6[%c0_27, %c0_28], %42 {strides = array<i32>} : memref<2x128xf32, #tpu.memory_space<vmem>>, vector<2x128xf32>,
    %c0_29 = arith.constant 0 : index
    %c0_30 = arith.constant 0 : index
    %44 = vector.load %arg7[%c0_29, %c0_30] : memref<2x128xf32, #tpu.memory_space<vmem>>, vector<2x128xf32>
    %cst_31 = arith.constant dense<0.000000e+00> : vector<2x128xf32>
    %45 = tpu.matmul %39, %31, %cst_31 {dimension_numbers = #tpu.dot_dimension_numbers<[1], [1], [0], [0], [0, 0, 1, 0], [], []>} : vector<2x128xf32>, vector<128x128xf32>, vector<2x128xf32> -> vector<2x128xf32>
    %46 = arith.addf %44, %45 : vector<2x128xf32>
    %c0_32 = arith.constant 0 : index
    %c0_33 = arith.constant 0 : index
    %47 = vector.load %arg7[%c0_32, %c0_33] : memref<2x128xf32, #tpu.memory_space<vmem>>, vector<2x128xf32>
    tpu.vector_store %arg7[%c0_32, %c0_33], %46 {strides = array<i32>} : memref<2x128xf32, #tpu.memory_space<vmem>>, vector<2x128xf32>,
    %c1_i32 = arith.constant 1 : i32
    %c0_34 = arith.constant 0 : index
    %c0_35 = arith.constant 0 : index
    %48 = vector.load %arg3[%c0_34, %c0_35] : memref<4x2xf32, #tpu.memory_space<vmem>>, vector<4x2xf32>
    %c0_36 = arith.constant 0 : index
    %c0_37 = arith.constant 0 : index
    %49 = vector.load %arg6[%c0_36, %c0_37] : memref<2x128xf32, #tpu.memory_space<vmem>>, vector<2x128xf32>
    %cst_38 = arith.constant dense<0.000000e+00> : vector<4x128xf32>
    %50 = tpu.matmul %48, %49, %cst_38 {dimension_numbers = #tpu.dot_dimension_numbers<[1], [0], [0], [1], [0, 0, 1, 1], [], []>} : vector<4x2xf32>, vector<2x128xf32>, vector<4x128xf32> -> vector<4x128xf32>
    %c0_39 = arith.constant 0 : index
    %c0_40 = arith.constant 0 : index
    %51 = vector.load %arg7[%c0_39, %c0_40] : memref<2x128xf32, #tpu.memory_space<vmem>>, vector<2x128xf32>
    %cst_41 = arith.constant dense<0.000000e+00> : vector<4x128xf32>
    %52 = tpu.matmul %48, %51, %cst_41 {dimension_numbers = #tpu.dot_dimension_numbers<[1], [0], [0], [1], [0, 0, 1, 1], [], []>} : vector<4x2xf32>, vector<2x128xf32>, vector<4x128xf32> -> vector<4x128xf32>
    %53 = vector.extract_strided_slice %1 {offsets = [0, 0], sizes = [4, 128], strides = [1, 1]} : vector<4x256xf32> to vector<4x128xf32>
    %54 = arith.addf %50, %53 : vector<4x128xf32>
    %c0_42 = arith.constant 0 : index
    %c0_43 = arith.constant 0 : index
    %c0_44 = arith.constant 0 : index
    %55 = vector.load %arg4[%c0_42, %c0_43, %c0_44] : memref<1x4x256xf32, #tpu.memory_space<vmem>>, vector<1x4x128xf32>
    %56 = vector.shape_cast %55 : vector<1x4x128xf32> to vector<4x128xf32>
    %57 = vector.shape_cast %54 : vector<4x128xf32> to vector<1x4x128xf32>
    tpu.vector_store %arg4[%c0_42, %c0_43, %c0_44], %57 {strides = array<i32>} : memref<1x4x256xf32, #tpu.memory_space<vmem>>, vector<1x4x128xf32>,
    %58 = vector.extract_strided_slice %1 {offsets = [0, 128], sizes = [4, 128], strides = [1, 1]} : vector<4x256xf32> to vector<4x128xf32>
    %59 = arith.addf %52, %58 : vector<4x128xf32>
    %c0_45 = arith.constant 0 : index
    %c0_46 = arith.constant 0 : index
    %c128_47 = arith.constant 128 : index
    %60 = vector.load %arg4[%c0_45, %c0_46, %c128_47] : memref<1x4x256xf32, #tpu.memory_space<vmem>>, vector<1x4x128xf32>
    %61 = vector.shape_cast %60 : vector<1x4x128xf32> to vector<4x128xf32>
    %62 = vector.shape_cast %59 : vector<4x128xf32> to vector<1x4x128xf32>
    tpu.vector_store %arg4[%c0_45, %c0_46, %c128_47], %62 {strides = array<i32>} : memref<1x4x256xf32, #tpu.memory_space<vmem>>, vector<1x4x128xf32>,
    return
  }
  func.func @transform_0(%arg0: i32) -> (i32, i32, i32) {
    %c0_i32 = arith.constant 0 : i32
    %c0_i32_0 = arith.constant 0 : i32
    %c0_i32_1 = arith.constant 0 : i32
    return %arg0, %c0_i32, %c0_i32_0 : i32, i32, i32
  }
  func.func @transform_1(%arg0: i32) -> (i32, i32) {
    %c0_i32 = arith.constant 0 : i32
    %c0_i32_0 = arith.constant 0 : i32
    %c0_i32_1 = arith.constant 0 : i32
    return %c0_i32, %c0_i32_0 : i32, i32
  }
  func.func @transform_2(%arg0: i32) -> (i32, i32) {
    %c0_i32 = arith.constant 0 : i32
    %c0_i32_0 = arith.constant 0 : i32
    %c0_i32_1 = arith.constant 0 : i32
    return %c0_i32, %c0_i32_0 : i32, i32
  }
  func.func @transform_3(%arg0: i32) -> (i32, i32, i32) {
    %c0_i32 = arith.constant 0 : i32
    %c0_i32_0 = arith.constant 0 : i32
    %c0_i32_1 = arith.constant 0 : i32
    return %arg0, %c0_i32, %c0_i32_0 : i32, i32, i32
  }
}

</mosaic_0001>

<bundles_post_ra>
// kernel: tpu_custom_call.1
= control target key start
LH: loop header
LB: loop body
LE: loop exit
PB: predicated region body
PF: predicated region fallthrough
CT: control target
= control target key end

     0   :  { %8 = vsyncpa [#allocation6], 0  ;;  %s1877_s0 = inlined_call_operand.vmem [shape: f32[2,4,256], index: 0, kind: input, shape index: {}]   ;;  %s1878_s1 = inlined_call_operand.vmem [shape: f32[6,4], index: 1, kind: input, shape index: {}]   ;;  %s1879_s2 = inlined_call_operand.vmem [shape: f32[4,2], index: 2, kind: input, shape index: {}]   ;;  %s1880_s3 = inlined_call_operand.hbm [shape: f32[2,4,256], index: 3, kind: output, shape index: {}]  }
   0x1   :  { %10 = vsyncpa [#allocation6 + $0x1], 0  ;;  %s1623_s12 = smov 0   ;;  %s1625_s13 = smov 0  }
   0x2   :  { %s1627_s14 = smov 0   ;;  %s1629_s15 = smov 0  }
   0x3 LB: > { %s1644_s16 = sadd.s32 4294967295, %s1598_s15   ;;  %s1203_s17 = sadd.s32 4294967294, %s1598_s15   ;;  %s1598_s15 = sphi %s1629_s15, %s1886_s15   ;;  %s1594_s14 = sphi %s1627_s14, %s1885_s14   ;;  %s1590_s13 = sphi %s1625_s13, %s1884_s13   ;;  %s1586_s12 = sphi %s1623_s12, %s1883_s12  }
   0x4   : > { %s1648_s18 = sadd.s32 1, %s1598_s15   ;;  %s91_s19 = sadd.s32 1, %s1594_s14 }
   0x5   : > { %s88_s20 = ssub.s32 %s1598_s15, %s1648_s18  ;;  %p101_p0 = scmp.ne.s32.totalorder %s1594_s14, %s1590_s13 }
   0x6   : > { %p89_p1 = scmp.eq.s32.totalorder %s88_s20, 0  ;;  %p102_p2 = scmp.eq.s32.totalorder %s1644_s16, 1 }
   0x7   : > { %p107_p3 = scmp.ne.s32.totalorder %s1590_s13, %s1586_s12  ;;  %p108_p4 = scmp.eq.s32.totalorder %s1203_s17, 1 }
   0x8   : > { %s1659_s21 = scalar_select %p89_p1, %s1594_s14, %s91_s19  }
   0x9   : > { %p1661_p5 = por %p102_p2, %p101_p0  ;;  %p1665_p6 = por %p108_p4, %p107_p3 }
   0xa   : > { %p1206_p7 = scmp.ge.s32.totalorder %s1598_s15, 1  ;;  %p140_p8 = scmp.lt.s32.totalorder %s1598_s15, 3 }
   0xc   : > { %p141_p9 = pnand %p1206_p7, %p140_p8 }
   0xd   : > { %p164_p10 = scmp.lt.s32.totalorder (!%p141_p9), %s1644_s16, 1  ;;  %s161_s6 = sand.u32 (!%p141_p9), 1, %s1590_s13  }
   0xe   : > { %144 = sbr.rel (%p141_p9) target bundleno = 1192 (0x4a8), region = 32  ;;  %s1207_s7 = sshll.u32 (!%p141_p9), %s161_s6, 3 }
   0xf   : > { %s1257_s8 = sshll.u32 (!%p141_p9), %s1644_s16, 7  ;;  %s163_s9 = scalar_lea.vmem (!%p141_p9), [#allocation5], %s1207_s7 }
  0x10   : > { %s1144_s10 = sshll.u32 (!%p141_p9), %s163_s9, 4  ;;  %s1836_s19 = scalar_lea.hbm (!%p141_p9), %s1880_s3, %s1257_s8  ;;  %s1838_s10 = int_to_ptr.vmem [resolvable:$true] %s1144_s10 }
  0x11   : > { %s1538_s20 = scalar_lea.vmem (!%p141_p9), %s1838_s10, 128 }
  0x12   : > { %p1539_p11 = scmp.ne.s32.totalorder (!%p141_p9), %s1838_s10, %s1538_s20 }
  0x13   : > { %v1600_v0 = vmov 0.0   ;;  %s165_s24 = scalar_select %p164_p10, %s1644_s16, 1  ;;  %vm177_vm0 = vcmask 1043456   ;;  %v170_v3 = vld [vmem:[%s1878_s1] sm:$0x3f]  ;;  %vm173_vm1 = vcmask 31744  }
  0x14   : > { %246 = vmatprep.mubr.f32.mxu0 %v1600_v0  ;;  %257 = vst [vmem:[#allocation3] sm:$0x3] %v1600_v0  ;;  %258 = vst [vmem:[#allocation4] sm:$0x3] %v1600_v0  ;;  %vm348_vm2 = vcmask 1041408   ;;  %vm299_vm3 = vcmask 15360   ;;  %p1540_p12 = pnand %p1539_p11, %p1661_p5 }
  0x15   : > { %s1256_s25 = sshll.u32 %s165_s24, 3  ;;  %vm1601_vm4 = vmmov 0   ;;  %s1130_s16 = scalar_lea.sflag [#allocation6], %s161_s6 }
  0x16   : > { %s168_s28 = scalar_lea.vmem %s1877_s0, %s1256_s25  ;;  %p1541_p13 = pneg %p1540_p12 }
  0x17   : > { %v1679_v1 = vld [vmem:[%s168_s28] sm:$0xff]  ;;  %s1602_s24 = smov [#allocation5]  }
  0x18   : > { %v1683_v2 = vcombine.high %v1679_v1, %v1679_v1  ;;  %s1542_s25 = sshll.u32 %s1602_s24, 4  ;;  %s1543_s25 = int_to_ptr.vmem [resolvable:$false] %s1542_s25 }
  0x19   : > { %s1544_s26 = scalar_lea.vmem %s1543_s25, 256  ;;  %p1545_p0 = scmp.lt.s32.totalorder %s1838_s10, %s1543_s25 }
  0x1a   : > { %1210 = vmatprep.subr.msk.mxu0 %vm177_vm0, %v1683_v2  ;;  %p1546_p1 = scmp.lt.s32.totalorder %s1544_s26, %s1538_s20 }
  0x1b   : > { %1211 = vmatpush1.msk.msra.mxu0 %vm177_vm0, %v1679_v1 }
  0x1c   : > { %1212 = vmatmul.mubr.msk.f32.vlgmr.msra.gmra.mxu0 %vm173_vm1, %v170_v3  ;;  %p1547_p2 = por %p1546_p1, %p1545_p0 }
  0x1e   : > { %p1548_p3 = pnand %p1547_p2, %p1541_p13 }
  0xdc   : > { %v248_v4 = vpop.f32.mrf.mxu0 }
  0xdd   : > { %253 = vst [vmem:[#allocation2] sm:$0x3f] %v248_v4 }
  0xde   : > { %v250_v5 = vpop.f32.mrf.mxu0 }
  0xdf   : > { %254 = vst [vmem:[#allocation2 + $0x8] sm:$0x3f] %v250_v5 }
  0xe4   : > { %v259_v6 = vld [vmem:[#allocation2] sm:$0x3]  ;;  %v255_v10 = vld [vmem:[#allocation2] sm:$0xc] }
  0xe5   : > { %1356 = vmatprep.subr.msk.mxu0 %vm348_vm2, %v259_v6  ;;  %v498_v11 = vrot.slane %v255_v10, 2 }
  0xe6   : > { %1357 = vmatpush3.msk.msra.mxu0 %vm348_vm2, %v259_v6  ;;  %v261_v7 = vld [vmem:[#allocation2 + $0x8] sm:$0x3]  ;;  %v256_v8 = vld [vmem:[#allocation2 + $0x8] sm:$0xc] }
  0xe7   : > { %1330 = vmatprep.subr.msk.mxu1 %vm348_vm2, %v261_v7  ;;  %v265_v9 = vrot.slane %v256_v8, 2  ;;  %1417 = vmatprep.subr.mxu0 %v1600_v0 }
  0xe8   : > { %1331 = vmatpush3.msk.msra.mxu1 %vm348_vm2, %v261_v7 }
  0xe9   : > { %267 = vxpose.xlu0.b32.start.end [1/1] (short) %v265_v9, 128  ;;  %1382 = vmatprep.subr.mxu1 %v1600_v0 }
 0x126   : > { %500 = vxpose.xlu0.b32.start.end [1/1] (short) %v498_v11, 128 }
 0x165   : > { %v283_v12 = vpop.trf.xlu0 }
 0x166   : > { %1332 = vmatprep.mubr.msk.f32.mxu1 %vm299_vm3, %v283_v12 }
 0x169   : > { %v284_v13 = vpop.trf.xlu0 }
 0x16a   : > { %1333 = vmatmul.mubr.msk.f32.vlgmr.msra.gmra.mxu1 %vm299_vm3, %v284_v13 }
 0x16d   : > { %v285_v14 = vpop.trf.xlu0 }
 0x16e   : > { %1335 = vmatprep.mubr.msk.f32.mxu1 %vm299_vm3, %v285_v14 }
 0x171   : > { %v286_v15 = vpop.trf.xlu0 }
 0x172   : > { %1336 = vmatmul.mubr.msk.f32.gmra.mxu1 %vm299_vm3, %v286_v15 }
 0x175   : > { %v287_v16 = vpop.trf.xlu0 }
 0x176   : > { %1338 = vmatprep.mubr.msk.f32.mxu1 %vm299_vm3, %v287_v16 }
 0x179   : > { %v288_v17 = vpop.trf.xlu0 }
 0x17a   : > { %1339 = vmatmul.mubr.msk.f32.gmra.mxu1 %vm299_vm3, %v288_v17 }
 0x17d   : > { %v289_v18 = vpop.trf.xlu0 }
 0x17e   : > { %1341 = vmatprep.mubr.msk.f32.mxu1 %vm299_vm3, %v289_v18 }
 0x181   : > { %v290_v19 = vpop.trf.xlu0 }
 0x182   : > { %1342 = vmatmul.mubr.msk.f32.gmra.mxu1 %vm299_vm3, %v290_v19 }
 0x185   : > { %v291_v20 = vpop.trf.xlu0 }
 0x186   : > { %1344 = vmatprep.mubr.msk.f32.mxu1 %vm299_vm3, %v291_v20 }
 0x189   : > { %v292_v21 = vpop.trf.xlu0 }
 0x18a   : > { %1345 = vmatmul.mubr.msk.f32.gmra.mxu1 %vm299_vm3, %v292_v21 }
 0x18d   : > { %v293_v22 = vpop.trf.xlu0 }
 0x18e   : > { %1347 = vmatprep.mubr.msk.f32.mxu1 %vm299_vm3, %v293_v22 }
 0x191   : > { %v294_v23 = vpop.trf.xlu0 }
 0x192   : > { %1348 = vmatmul.mubr.msk.f32.gmra.mxu1 %vm299_vm3, %v294_v23 }
 0x195   : > { %v295_v24 = vpop.trf.xlu0 }
 0x196   : > { %1350 = vmatprep.mubr.msk.f32.mxu1 %vm299_vm3, %v295_v24 }
 0x199   : > { %v296_v25 = vpop.trf.xlu0 }
 0x19a   : > { %1351 = vmatmul.mubr.msk.f32.gmra.mxu1 %vm299_vm3, %v296_v25 }
 0x19d   : > { %v297_v26 = vpop.trf.xlu0 }
 0x19e   : > { %1353 = vmatprep.mubr.msk.f32.mxu1 %vm299_vm3, %v297_v26 }
 0x1a1   : > { %v298_v27 = vpop.trf.xlu0 }
 0x1a2   : > { %1354 = vmatmul.mubr.msk.f32.gmra.mxu1 %vm299_vm3, %v298_v27 }
 0x1a3   : > { %1414 = vmatprep.mubr.msk.f32.mxu1 %vm1601_vm4, %v1600_v0 }
 0x1a5   : > { %v516_v28 = vpop.trf.xlu0 }
 0x1a6   : > { %1358 = vmatprep.mubr.msk.f32.mxu0 %vm299_vm3, %v516_v28 }
 0x1a9   : > { %v517_v29 = vpop.trf.xlu0 }
 0x1aa   : > { %1359 = vmatmul.mubr.msk.f32.vlgmr.msra.gmra.mxu0 %vm299_vm3, %v517_v29 }
 0x1ad   : > { %v518_v30 = vpop.trf.xlu0 }
 0x1ae   : > { %1361 = vmatprep.mubr.msk.f32.mxu0 %vm299_vm3, %v518_v30 }
 0x1b1   : > { %v519_v31 = vpop.trf.xlu0 }
 0x1b2   : > { %1362 = vmatmul.mubr.msk.f32.gmra.mxu0 %vm299_vm3, %v519_v31 }
 0x1b5   : > { %v520_v32 = vpop.trf.xlu0 }
 0x1b6   : > { %1364 = vmatprep.mubr.msk.f32.mxu0 %vm299_vm3, %v520_v32 }
 0x1b9   : > { %v521_v33 = vpop.trf.xlu0 }
 0x1ba   : > { %1365 = vmatmul.mubr.msk.f32.gmra.mxu0 %vm299_vm3, %v521_v33 }
 0x1bd   : > { %v522_v34 = vpop.trf.xlu0 }
 0x1be   : > { %1367 = vmatprep.mubr.msk.f32.mxu0 %vm299_vm3, %v522_v34 }
 0x1c1   : > { %v523_v35 = vpop.trf.xlu0 }
 0x1c2   : > { %1368 = vmatmul.mubr.msk.f32.gmra.mxu0 %vm299_vm3, %v523_v35 }
 0x1c5   : > { %v524_v36 = vpop.trf.xlu0 }
 0x1c6   : > { %1370 = vmatprep.mubr.msk.f32.mxu0 %vm299_vm3, %v524_v36 }
 0x1c9   : > { %v525_v37 = vpop.trf.xlu0 }
 0x1ca   : > { %1371 = vmatmul.mubr.msk.f32.gmra.mxu0 %vm299_vm3, %v525_v37 }
 0x1cd   : > { %v526_v38 = vpop.trf.xlu0 }
 0x1ce   : > { %1373 = vmatprep.mubr.msk.f32.mxu0 %vm299_vm3, %v526_v38 }
 0x1d1   : > { %v527_v39 = vpop.trf.xlu0 }
 0x1d2   : > { %1374 = vmatmul.mubr.msk.f32.gmra.mxu0 %vm299_vm3, %v527_v39 }
 0x1d5   : > { %v528_v40 = vpop.trf.xlu0 }
 0x1d6   : > { %1376 = vmatprep.mubr.msk.f32.mxu0 %vm299_vm3, %v528_v40 }
 0x1d9   : > { %v529_v41 = vpop.trf.xlu0 }
 0x1da   : > { %1377 = vmatmul.mubr.msk.f32.gmra.mxu0 %vm299_vm3, %v529_v41 }
 0x1dd   : > { %v530_v42 = vpop.trf.xlu0 }
 0x1de   : > { %1379 = vmatprep.mubr.msk.f32.mxu0 %vm299_vm3, %v530_v42 }
 0x1e1   : > { %v531_v43 = vpop.trf.xlu0 }
 0x1e2   : > { %1380 = vmatmul.mubr.msk.f32.gmra.mxu0 %vm299_vm3, %v531_v43 }
 0x1e3   : > { %1449 = vmatprep.mubr.msk.f32.mxu0 %vm1601_vm4, %v1600_v0 }
 0x22a   : > { %v1334_v44 = vpop.f32.mrf.mxu1 }
 0x22c   : > { %v418_v46 = vpop.f32.mrf.mxu1 }
 0x232   : > { %v1337_v48 = vpop.f32.mrf.mxu1 }
 0x234   : > { %v428_v50 = vpop.f32.mrf.mxu1 }
 0x23a   : > { %v1340_v52 = vpop.f32.mrf.mxu1 }
 0x23c   : > { %v438_v54 = vpop.f32.mrf.mxu1 }
 0x242   : > { %v1343_v56 = vpop.f32.mrf.mxu1 }
 0x244   : > { %v448_v58 = vpop.f32.mrf.mxu1 }
 0x24a   : > { %v1346_v60 = vpop.f32.mrf.mxu1 }
 0x24c   : > { %v458_v62 = vpop.f32.mrf.mxu1 }
 0x252   : > { %v1349_v3 = vpop.f32.mrf.mxu1 }
 0x254   : > { %v468_v5 = vpop.f32.mrf.mxu1 }
 0x25a   : > { %v1352_v7 = vpop.f32.mrf.mxu1 }
 0x25c   : > { %v478_v10 = vpop.f32.mrf.mxu1 }
 0x262   : > { %v1355_v17 = vpop.f32.mrf.mxu1 }
 0x264   : > { %v488_v33 = vpop.f32.mrf.mxu1 }
 0x26a   : > { %v1360_v45 = vpop.f32.mrf.mxu0 }
 0x26b   : > { %v655_v18 = vadd.f32 %v1360_v45, %v1334_v44 }
 0x26c   : > { %v649_v47 = vpop.f32.mrf.mxu0 }
 0x26d   : > { %v650_v14 = vadd.f32 %v649_v47, %v418_v46 }
 0x272   : > { %v1363_v49 = vpop.f32.mrf.mxu0 }
 0x273   : > { %v665_v19 = vadd.f32 %v1363_v49, %v1337_v48 }
 0x274   : > { %v659_v51 = vpop.f32.mrf.mxu0 }
 0x275   : > { %v660_v20 = vadd.f32 %v659_v51, %v428_v50 }
 0x27a   : > { %v1366_v53 = vpop.f32.mrf.mxu0 }
 0x27b   : > { %v1734_v11 = vadd.f32 %v1366_v53, %v1340_v52 }
 0x27c   : > { %v669_v55 = vpop.f32.mrf.mxu0 }
 0x27d   : > { %v1732_v9 = vadd.f32 %v669_v55, %v438_v54  ;;  %v729_v26 = vmax.f32 %v655_v18, %v1734_v11 }
 0x27f   : > { %v728_v22 = vmax.f32 %v650_v14, %v1732_v9 }
 0x282   : > { %v1369_v57 = vpop.f32.mrf.mxu0 }
 0x283   : > { %v1736_v12 = vadd.f32 %v1369_v57, %v1343_v56 }
 0x284   : > { %v679_v59 = vpop.f32.mrf.mxu0 }
 0x285   : > { %v1738_v15 = vadd.f32 %v679_v59, %v448_v58  ;;  %v731_v27 = vmax.f32 %v665_v19, %v1736_v12 }
 0x287   : > { %v730_v29 = vmax.f32 %v660_v20, %v1738_v15 }
 0x28a   : > { %v1372_v61 = vpop.f32.mrf.mxu0 }
 0x28b   : > { %v1742_v21 = vadd.f32 %v1372_v61, %v1346_v60 }
 0x28c   : > { %v689_v63 = vpop.f32.mrf.mxu0 }
 0x28d   : > { %v1740_v16 = vadd.f32 %v689_v63, %v458_v62  ;;  %v733_v34 = vmax.f32 %v729_v26, %v1742_v21 }
 0x28f   : > { %v732_v30 = vmax.f32 %v728_v22, %v1740_v16 }
 0x292   : > { %v1375_v4 = vpop.f32.mrf.mxu0 }
 0x293   : > { %v705_v23 = vadd.f32 %v1375_v4, %v1349_v3 }
 0x294   : > { %v699_v6 = vpop.f32.mrf.mxu0 }
 0x295   : > { %v700_v24 = vadd.f32 %v699_v6, %v468_v5  ;;  %v735_v36 = vmax.f32 %v731_v27, %v705_v23 }
 0x297   : > { %v734_v37 = vmax.f32 %v730_v29, %v700_v24 }
 0x29a   : > { %v1378_v8 = vpop.f32.mrf.mxu0 }
 0x29b   : > { %v715_v31 = vadd.f32 %v1378_v8, %v1352_v7 }
 0x29c   : > { %v709_v13 = vpop.f32.mrf.mxu0 }
 0x29d   : > { %v710_v25 = vadd.f32 %v709_v13, %v478_v10  ;;  %v737_v40 = vmax.f32 %v733_v34, %v715_v31 }
 0x29f   : > { %v736_v38 = vmax.f32 %v732_v30, %v710_v25 }
 0x2a1   : > { %v740_v43 = vmax.f32 %v736_v38, %v737_v40 }
 0x2a2   : > { %v1381_v28 = vpop.f32.mrf.mxu0 }
 0x2a3   : > { %v725_v32 = vadd.f32 %v1381_v28, %v1355_v17 }
 0x2a4   : > { %v719_v35 = vpop.f32.mrf.mxu0 }
 0x2a5   : > { %v720_v39 = vadd.f32 %v719_v35, %v488_v33  ;;  %v739_v41 = vmax.f32 %v735_v36, %v725_v32 }
 0x2a7   : > { %v738_v42 = vmax.f32 %v734_v37, %v720_v39 }
 0x2a9   : > { %v741_v44 = vmax.f32 %v738_v42, %v739_v41 }
 0x2ab   : > { %v742_v45 = vmax.f32 %v740_v43, %v741_v44 }
 0x2ad   : > { %v743_v46 = vrot.slane %v742_v45, 4 }
 0x2af   : > { %v744_v47 = vmax.f32 %v742_v45, %v743_v46 }
 0x2b1   : > { %v745_v48 = vrot.slane %v744_v47, 2 }
 0x2b3   : > { %v746_v49 = vmax.f32 %v744_v47, %v745_v48 }
 0x2b5   : > { %v747_v50 = vrot.slane %v746_v49, 1 }
 0x2b7   : > { %v748_v51 = vmax.f32 %v746_v49, %v747_v50 }
 0x2b9   : > { %v764_v52 = vsub.f32 %v725_v32, %v748_v51  ;;  %v763_v53 = vsub.f32 %v720_v39, %v748_v51  ;;  %v762_v56 = vsub.f32 %v715_v31, %v748_v51  ;;  %v761_v58 = vsub.f32 %v710_v25, %v748_v51 }
 0x2ba   : > { %v750_v59 = vsub.f32 %v655_v18, %v748_v51  ;;  %v749_v60 = vsub.f32 %v650_v14, %v748_v51  ;;  %v760_v61 = vsub.f32 %v705_v23, %v748_v51  ;;  %v751_v63 = vsub.f32 %v660_v20, %v748_v51 }
 0x2bb   : > { %v795_v54 = vmul.f32 1.442695, %v764_v52  ;;  %v793_v55 = vmul.f32 1.442695, %v763_v53  ;;  %v791_v57 = vmul.f32 1.442695, %v762_v56  ;;  %v752_v4 = vsub.f32 %v665_v19, %v748_v51 }
 0x2bc   : > { %v789_v62 = vmul.f32 1.442695, %v761_v58  ;;  %v767_v3 = vmul.f32 1.442695, %v750_v59  ;;  %v765_v5 = vmul.f32 1.442695, %v749_v60  ;;  %v759_v7 = vsub.f32 %v700_v24, %v748_v51 }
 0x2bd   : > { %1504 = vpow2.f32 %v795_v54  ;;  %v787_v6 = vmul.f32 1.442695, %v760_v61  ;;  %v753_v8 = vsub.f32 %v1732_v9, %v748_v51  ;;  %v769_v10 = vmul.f32 1.442695, %v751_v63  ;;  %v262_v61 = vld [vmem:[#allocation2] sm:$0x30] }
 0x2be   : > { %1506 = vpow2.f32 %v793_v55  ;;  %v754_v14 = vsub.f32 %v1734_v11, %v748_v51  ;;  %v771_v17 = vmul.f32 1.442695, %v752_v4  ;;  %v785_v18 = vmul.f32 1.442695, %v759_v7  ;;  %v898_v7 = vld [vmem:[#allocation4] sm:$0x3] }
 0x2bf   : > { %1508 = vpow2.f32 %v791_v57  ;;  %v758_v9 = vsub.f32 %v1742_v21, %v748_v51  ;;  %v755_v19 = vsub.f32 %v1738_v15, %v748_v51  ;;  %v773_v20 = vmul.f32 1.442695, %v753_v8 }
 0x2c0   : > { %1510 = vpow2.f32 %v789_v62  ;;  %v756_v11 = vsub.f32 %v1736_v12, %v748_v51  ;;  %v775_v23 = vmul.f32 1.442695, %v754_v14  ;;  %v757_v15 = vsub.f32 %v1740_v16, %v748_v51  ;;  %v263_v62 = vld [vmem:[#allocation2 + $0x8] sm:$0x30] }
 0x2c1   : > { %1512 = vpow2.f32 %v767_v3  ;;  %v783_v21 = vmul.f32 1.442695, %v758_v9  ;;  %v777_v24 = vmul.f32 1.442695, %v755_v19  ;;  %v974_v9 = vld [vmem:[%s1879_s2] sm:$0xf] }
 0x2c2   : > { %1514 = vpow2.f32 %v765_v5  ;;  %v779_v26 = vmul.f32 1.442695, %v756_v11  ;;  %v781_v12 = vmul.f32 1.442695, %v757_v15 }
 0x2c3   : > { %1516 = vpow2.f32 %v787_v6  ;;  %v822_v6 = vld [vmem:[#allocation3] sm:$0x3] }
 0x2c4   : > { %1518 = vpow2.f32 %v769_v10 }
 0x2c5   : > { %1520 = vpow2.f32 %v771_v17 }
 0x2c6   : > { %1522 = vpow2.f32 %v785_v18 }
 0x2c7   : > { %1524 = vpow2.f32 %v773_v20 }
 0x2c8   : > { %1526 = vpow2.f32 %v775_v23 }
 0x2c9   : > { %1528 = vpow2.f32 %v783_v21 }
 0x2ca   : > { %v1751_v13 = vpop.eup %1504  ;;  %1530 = vpow2.f32 %v777_v24 }
 0x2cb   : > { %1383 = vmatpush3.xpose.msra.mxu1 %v1751_v13  ;;  %1418 = vmatpush3.xpose.msra.mxu0 %v1751_v13  ;;  %v1760_v22 = vpop.eup %1506  ;;  %1532 = vpow2.f32 %v779_v26 }
 0x2cc   : > { %1384 = vmatprep.subr.mxu1 %v1600_v0  ;;  %1419 = vmatprep.subr.mxu0 %v1600_v0  ;;  %v1768_v25 = vpop.eup %1508  ;;  %1534 = vpow2.f32 %v781_v12 }
 0x2cd   : > { %v1511_v27 = vpop.eup %1510 }
 0x2ce   : > { %v1774_v28 = vpop.eup %1512 }
 0x2cf   : > { %1385 = vmatpush3.xpose.msra.mxu1 %v1760_v22  ;;  %1420 = vmatpush3.xpose.msra.mxu0 %v1760_v22  ;;  %v1776_v16 = vpop.eup %1514 }
 0x2d0   : > { %1386 = vmatprep.subr.mxu1 %v1600_v0  ;;  %1421 = vmatprep.subr.mxu0 %v1600_v0  ;;  %v1517_v29 = vpop.eup %1516  ;;  %v797_v30 = vadd.f32 %v1776_v16, %v1774_v28 }
 0x2d1   : > { %v1782_v31 = vpop.eup %1518 }
 0x2d2   : > { %v798_v32 = vadd.f32 %v1782_v31, %v797_v30  ;;  %v1521_v33 = vpop.eup %1520 }
 0x2d3   : > { %1387 = vmatpush3.xpose.msra.mxu1 %v1768_v25  ;;  %1422 = vmatpush3.xpose.msra.mxu0 %v1768_v25  ;;  %v1523_v34 = vpop.eup %1522 }
 0x2d4   : > { %1388 = vmatprep.subr.mxu1 %v1600_v0  ;;  %1423 = vmatprep.subr.mxu0 %v1600_v0  ;;  %v799_v35 = vadd.f32 %v1521_v33, %v798_v32  ;;  %v1525_v36 = vpop.eup %1524 }
 0x2d5   : > { %v1527_v38 = vpop.eup %1526 }
 0x2d6   : > { %v800_v37 = vadd.f32 %v1525_v36, %v799_v35  ;;  %v1529_v39 = vpop.eup %1528 }
 0x2d7   : > { %1389 = vmatpush3.xpose.msra.mxu1 %v1511_v27  ;;  %1424 = vmatpush3.xpose.msra.mxu0 %v1511_v27  ;;  %v1531_v41 = vpop.eup %1530 }
 0x2d8   : > { %1390 = vmatprep.subr.mxu1 %v1600_v0  ;;  %1425 = vmatprep.subr.mxu0 %v1600_v0  ;;  %v801_v40 = vadd.f32 %v1527_v38, %v800_v37  ;;  %v1533_v43 = vpop.eup %1532 }
 0x2d9   : > { %v1535_v45 = vpop.eup %1534 }
 0x2da   : > { %v802_v42 = vadd.f32 %v1531_v41, %v801_v40 }
 0x2db   : > { %1391 = vmatpush3.xpose.msra.mxu1 %v1517_v29  ;;  %1426 = vmatpush3.xpose.msra.mxu0 %v1517_v29 }
 0x2dc   : > { %1392 = vmatprep.subr.mxu1 %v1600_v0  ;;  %1427 = vmatprep.subr.mxu0 %v1600_v0  ;;  %v803_v44 = vadd.f32 %v1533_v43, %v802_v42 }
 0x2de   : > { %v804_v46 = vadd.f32 %v1535_v45, %v803_v44 }
 0x2df   : > { %1393 = vmatpush3.xpose.msra.mxu1 %v1523_v34  ;;  %1428 = vmatpush3.xpose.msra.mxu0 %v1523_v34 }
 0x2e0   : > { %1394 = vmatprep.subr.mxu1 %v1600_v0  ;;  %1429 = vmatprep.subr.mxu0 %v1600_v0  ;;  %v805_v47 = vadd.f32 %v1529_v39, %v804_v46 }
 0x2e2   : > { %v806_v48 = vadd.f32 %v1523_v34, %v805_v47 }
 0x2e3   : > { %1395 = vmatpush3.xpose.msra.mxu1 %v1529_v39  ;;  %1430 = vmatpush3.xpose.msra.mxu0 %v1529_v39 }
 0x2e4   : > { %1396 = vmatprep.subr.mxu1 %v1600_v0  ;;  %1431 = vmatprep.subr.mxu0 %v1600_v0  ;;  %v807_v49 = vadd.f32 %v1517_v29, %v806_v48 }
 0x2e6   : > { %v808_v50 = vadd.f32 %v1511_v27, %v807_v49 }
 0x2e7   : > { %1397 = vmatpush3.xpose.msra.mxu1 %v1535_v45  ;;  %1432 = vmatpush3.xpose.msra.mxu0 %v1535_v45 }
 0x2e8   : > { %1398 = vmatprep.subr.mxu1 %v1600_v0  ;;  %1433 = vmatprep.subr.mxu0 %v1600_v0  ;;  %v809_v51 = vadd.f32 %v1768_v25, %v808_v50 }
 0x2ea   : > { %v810_v52 = vadd.f32 %v1760_v22, %v809_v51 }
 0x2eb   : > { %1399 = vmatpush3.xpose.msra.mxu1 %v1533_v43  ;;  %1434 = vmatpush3.xpose.msra.mxu0 %v1533_v43 }
 0x2ec   : > { %1400 = vmatprep.subr.mxu1 %v1600_v0  ;;  %1435 = vmatprep.subr.mxu0 %v1600_v0  ;;  %v811_v53 = vadd.f32 %v1751_v13, %v810_v52 }
 0x2ee   : > { %v812_v54 = vrot.slane %v811_v53, 4 }
 0x2ef   : > { %1401 = vmatpush3.xpose.msra.mxu1 %v1531_v41  ;;  %1436 = vmatpush3.xpose.msra.mxu0 %v1531_v41 }
 0x2f0   : > { %1402 = vmatprep.subr.mxu1 %v1600_v0  ;;  %1437 = vmatprep.subr.mxu0 %v1600_v0  ;;  %v813_v55 = vadd.f32 %v812_v54, %v811_v53 }
 0x2f2   : > { %v814_v56 = vrot.slane %v813_v55, 2 }
 0x2f3   : > { %1403 = vmatpush3.xpose.msra.mxu1 %v1527_v38  ;;  %1438 = vmatpush3.xpose.msra.mxu0 %v1527_v38 }
 0x2f4   : > { %1404 = vmatprep.subr.mxu1 %v1600_v0  ;;  %1439 = vmatprep.subr.mxu0 %v1600_v0  ;;  %v815_v57 = vadd.f32 %v814_v56, %v813_v55 }
 0x2f6   : > { %v816_v58 = vrot.slane %v815_v57, 1 }
 0x2f7   : > { %1405 = vmatpush3.xpose.msra.mxu1 %v1525_v36  ;;  %1440 = vmatpush3.xpose.msra.mxu0 %v1525_v36 }
 0x2f8   : > { %1406 = vmatprep.subr.mxu1 %v1600_v0  ;;  %1441 = vmatprep.subr.mxu0 %v1600_v0  ;;  %v817_v59 = vadd.f32 %v816_v58, %v815_v57 }
 0x2fa   : > { %1536 = vrcp.f32 %v817_v59 }
 0x2fb   : > { %1407 = vmatpush3.xpose.msra.mxu1 %v1521_v33  ;;  %1442 = vmatpush3.xpose.msra.mxu0 %v1521_v33 }
 0x2fc   : > { %1408 = vmatprep.subr.mxu1 %v1600_v0  ;;  %1443 = vmatprep.subr.mxu0 %v1600_v0 }
 0x2ff   : > { %1409 = vmatpush3.xpose.msra.mxu1 %v1782_v31  ;;  %1444 = vmatpush3.xpose.msra.mxu0 %v1782_v31 }
 0x300   : > { %1410 = vmatprep.subr.mxu1 %v1600_v0  ;;  %1445 = vmatprep.subr.mxu0 %v1600_v0 }
 0x303   : > { %1411 = vmatpush3.xpose.msra.mxu1 %v1774_v28  ;;  %1446 = vmatpush3.xpose.msra.mxu0 %v1774_v28 }
 0x304   : > { %1412 = vmatprep.subr.mxu1 %v1600_v0  ;;  %1447 = vmatprep.subr.mxu0 %v1600_v0 }
 0x307   : > { %1413 = vmatpush3.xpose.msra.mxu1 %v1776_v16  ;;  %1448 = vmatpush3.xpose.msra.mxu0 %v1776_v16  ;;  %v1537_v60 = vpop.eup %1536 }
 0x308   : > { %1452 = vmatprep.subr.mxu1 %v1600_v0  ;;  %1457 = vmatprep.subr.mxu0 %v1600_v0  ;;  %v820_v63 = vmul.f32 %v1537_v60, %v262_v61  ;;  %v821_v3 = vmul.f32 %v1537_v60, %v263_v62 }
 0x30a   : > { %v824_v4 = vrot.slane %v820_v63, 4  ;;  %v900_v5 = vrot.slane %v821_v3, 4 }
 0x30c   : > { %1415 = vmatmul.mubr.f32.vlgmr.msra.gmra.mxu1 %v824_v4  ;;  %1450 = vmatmul.mubr.f32.vlgmr.msra.gmra.mxu0 %v900_v5 }
 0x30d   : > { %1454 = vmatprep.mubr.msk.f32.mxu1 %vm1601_vm4, %v1600_v0  ;;  %1459 = vmatprep.mubr.msk.f32.mxu0 %vm1601_vm4, %v1600_v0 }
 0x3cc   : > { %v892_v8 = vpop.f32.mrf.mxu1  ;;  %v968_v10 = vpop.f32.mrf.mxu0 }
 0x3cd   : > { %v896_v13 = vadd.f32 %v892_v8, %v822_v6  ;;  %v972_v14 = vadd.f32 %v968_v10, %v898_v7 }
 0x3ce   : > { %v1416_v17 = vpop.f32.mrf.mxu1  ;;  %v1451_v18 = vpop.f32.mrf.mxu0 }
 0x3cf   : > { %897 = vst [vmem:[#allocation3] sm:$0x3] %v896_v13  ;;  %973 = vst [vmem:[#allocation4] sm:$0x3] %v972_v14 }
 0x3d6   : > { %v975_v19 = vld [vmem:[#allocation3] sm:$0x3]  ;;  %v976_v20 = vld [vmem:[#allocation4] sm:$0x3] }
 0x3d7   : > { %1453 = vmatpush3.msk.msra.mxu1 %vm348_vm2, %v975_v19  ;;  %1458 = vmatpush3.msk.msra.mxu0 %vm348_vm2, %v976_v20 }
 0x3d8   : > { %1455 = vmatmul.mubr.msk.f32.vlgmr.msra.gmra.mxu1 %vm299_vm3, %v974_v9  ;;  %1460 = vmatmul.mubr.msk.f32.vlgmr.msra.gmra.mxu0 %vm299_vm3, %v974_v9 }
 0x498   : > { %v1049_v0 = vpop.f32.mrf.mxu1  ;;  %v1124_v22 = vpop.f32.mrf.mxu0 }
 0x499   : > { %v1050_v11 = vadd.f32 %v1049_v0, %v1679_v1  ;;  %v1125_v23 = vadd.f32 %v1124_v22, %v1683_v2 }
 0x49a   : > { %v1456_v21 = vpop.f32.mrf.mxu1  ;;  %v1461_v15 = vpop.f32.mrf.mxu0 }
 0x49b   : > { %1053 = vst [vmem:[%s163_s9] sm:$0xf] %v1050_v11  ;;  %1128 = vst [vmem:[%s163_s9 + $0x4] sm:$0xf] %v1125_v23 }
 0x49c   : > { %1551 = shalt.err (!%p1548_p3)
}
 0x49d   : > { %s1552_s27 = scalar_lea.hbm %s1836_s19, 128  ;;  %s1556_s30 = scalar_lea.hbm %s1880_s3, 256 }
 0x49e   : > { %p1553_p4 = scmp.ne.s32.totalorder %s1836_s19, %s1552_s27  ;;  %p1557_p9 = scmp.lt.s32.totalorder %s1836_s19, %s1880_s3 }
 0x49f   : > { %p1558_p10 = scmp.lt.s32.totalorder %s1556_s30, %s1552_s27 }
 0x4a0   : > { %p1554_p7 = pnand %p1553_p4, %p1661_p5 }
 0x4a1   : > { %p1559_p11 = por %p1558_p10, %p1557_p9 }
 0x4a2   : > { %p1555_p8 = pneg %p1554_p7 }
 0x4a4   : > { %p1560_p12 = pnand %p1559_p11, %p1555_p8 }
 0x4a6   : > { %1563 = shalt.err (!%p1560_p12)
}
 0x4a7   : > { %1462 = dma.vmem_to_hbm [thread:$0]  (%p1661_p5), %s1838_s10, 128, %s1836_s19, %s1130_s16  }
 0x4a8 PF: > { %p1468_p13 = scmp.ge.s32.totalorder %s1598_s15, 2  ;;  %s1156_s6 = sand.u32 1, %s1586_s12  }
 0x4a9   : > { %s1157_s7 = scalar_lea.sflag [#allocation6], %s1156_s6 }
 0x4aa   : > { %p1465_p0 = pnand %p1468_p13, %p1665_p6 }
 0x4ac   : > { %p1466_p1 = pneg %p1465_p0 }
 0x4ae   : > { %1581 = dma.done.wait (%p1466_p1), %s1157_s7, 128  }
 0x4af   : > { %1583 = vsyncadd (%p1466_p1), %s1157_s7, 4294967168  ;;  %p13_p2 = scmp.ge.s32.totalorder %s1648_s18, 4   ;;  %s1883_s12 = smov %s1590_s13 }
 0x4b0   : > { %s1884_s13 = smov %s1594_s14  ;;  %s1885_s14 = smov %s1659_s21 }
 0x4b1   : > { %s1886_s15 = smov %s1648_s18  ;;  %15 = sbr.rel (!%p13_p2) target bundleno = 3 (0x3), region = 68 }
 0x4b6   :  { %1162 = vsyncpa [#allocation6], 1 }
 0x4b7   :  { %1164 = vsyncpa [#allocation6 + $0x1], 1 }

</bundles_post_ra>
